<compile_context>
chip_gen: v7x
topology: tpu7x:2x2x1
jax: 0.10.0
libtpu: 0.0.40
codegen_flags: <defaults>
</compile_context>

<pallas_src>
import jax
import jax.numpy as jnp
from jax.experimental import pallas as pl
from jax.experimental.pallas import tpu as pltpu

ROW_TILE = 512          # rows per block (multiple of 8)
WIDTH_CANDIDATES = (1024, 512, 256, 128)   # lane-dense slab widths


def _mish_kernel(x_ref, o_ref):
    x = x_ref[...].astype(jnp.float32)
    t = jnp.exp(-jnp.abs(x))                      # single transcendental
    pos = x >= 0.0
    num = jnp.where(pos, 1.0 + 2.0 * t, t * t + 2.0 * t)
    den = jnp.where(pos, 2.0 * t * t + 2.0 * t + 1.0, t * t + 2.0 * t + 2.0)
    o_ref[...] = (x * (num / den)).astype(o_ref.dtype)


def _choose_width(n):
    """Pick a slab width that divides n (no pad) or fall back to 128 + pad."""
    for w in WIDTH_CANDIDATES:
        if n % w == 0:
            return w, 0
    w = 128
    return w, (-n) % w


def mish(x):
    """Apply Mish elementwise to an array of any shape (NCHW supported)."""
    orig_shape = x.shape
    orig_dtype = x.dtype

    flat = x.reshape(-1)
    n = flat.shape[0]
    width, pad = _choose_width(n)
    if pad:
        # Only hit for element counts not divisible by 128.
        flat = jnp.pad(flat, (0, pad))
    rows = flat.shape[0] // width
    x2d = flat.reshape(rows, width)

    block_rows = min(ROW_TILE, rows)   # full-dim block when the array is small
    grid = (pl.cdiv(rows, block_rows),)

    out2d = pl.pallas_call(
        _mish_kernel,
        out_shape=jax.ShapeDtypeStruct((rows, width), orig_dtype),
        grid=grid,
        in_specs=[pl.BlockSpec((block_rows, width), lambda i: (i, 0))],
        out_specs=pl.BlockSpec((block_rows, width), lambda i: (i, 0)),
        compiler_params=pltpu.CompilerParams(
            dimension_semantics=("parallel",)),
    )(x2d)

    if pad:
        return out2d.reshape(-1)[:n].reshape(orig_shape)
    return out2d.reshape(orig_shape)


def _mish_ref(x):
    # Pure-JAX reference for verification.
    return x * jnp.tanh(jax.nn.softplus(x))


if __name__ == "__main__":
    key = jax.random.PRNGKey(0)
    # NCHW, matching PyTorch conv-style inputs.
    x = jax.random.normal(key, (2, 4, 16, 16), dtype=jnp.float32)

    out = mish(x)
    out = jax.block_until_ready(out)

    ref = _mish_ref(x)
    assert out.shape == x.shape and out.dtype == x.dtype
    assert jnp.allclose(out, ref, atol=1e-5, rtol=1e-5)

    print("KERNEL_OK")
</pallas_src>

<mosaic_0001>
module attributes {stable_mosaic.version = 11 : i64} {
  func.func @_mish_kernel(%arg0: i32, %arg1: memref<2x1024xf32, #tpu.memory_space<vmem>>, %arg2: memref<2x1024xf32, #tpu.memory_space<vmem>>) attributes {dimension_semantics = [#tpu.dimension_semantics<parallel>], iteration_bounds = array<i64: 1>, scalar_prefetch = 0 : i64, scratch_operands = 0 : i64, tpu.core_type = #tpu.core_type<tc>, window_params = [{transform_indices = @transform_0, window_bounds = array<i64: 2, 1024>}, {transform_indices = @transform_1, window_bounds = array<i64: 2, 1024>}]} {
    %c0 = arith.constant 0 : index
    %c0_0 = arith.constant 0 : index
    %0 = vector.load %arg1[%c0, %c0_0] : memref<2x1024xf32, #tpu.memory_space<vmem>>, vector<2x1024xf32>
    %1 = math.absf %0 : vector<2x1024xf32>
    %cst = arith.constant 0.000000e+00 : f32
    %2 = vector.broadcast %cst : f32 to vector<2x1024xf32>
    %3 = arith.subf %2, %1 : vector<2x1024xf32>
    %4 = math.exp %3 : vector<2x1024xf32>
    %cst_1 = arith.constant 0.000000e+00 : f32
    %5 = vector.broadcast %cst_1 : f32 to vector<2x1024xf32>
    %6 = arith.cmpf oge, %0, %5 : vector<2x1024xf32>
    %cst_2 = arith.constant 2.000000e+00 : f32
    %7 = vector.broadcast %cst_2 : f32 to vector<2x1024xf32>
    %8 = arith.mulf %7, %4 : vector<2x1024xf32>
    %cst_3 = arith.constant 1.000000e+00 : f32
    %9 = vector.broadcast %cst_3 : f32 to vector<2x1024xf32>
    %10 = arith.addf %9, %8 : vector<2x1024xf32>
    %11 = arith.mulf %4, %4 : vector<2x1024xf32>
    %cst_4 = arith.constant 2.000000e+00 : f32
    %12 = vector.broadcast %cst_4 : f32 to vector<2x1024xf32>
    %13 = arith.mulf %12, %4 : vector<2x1024xf32>
    %14 = arith.addf %11, %13 : vector<2x1024xf32>
    %15 = arith.select %6, %10, %14 : vector<2x1024xi1>, vector<2x1024xf32>
    %cst_5 = arith.constant 2.000000e+00 : f32
    %16 = vector.broadcast %cst_5 : f32 to vector<2x1024xf32>
    %17 = arith.mulf %16, %4 : vector<2x1024xf32>
    %18 = arith.mulf %17, %4 : vector<2x1024xf32>
    %cst_6 = arith.constant 2.000000e+00 : f32
    %19 = vector.broadcast %cst_6 : f32 to vector<2x1024xf32>
    %20 = arith.mulf %19, %4 : vector<2x1024xf32>
    %21 = arith.addf %18, %20 : vector<2x1024xf32>
    %cst_7 = arith.constant 1.000000e+00 : f32
    %22 = vector.broadcast %cst_7 : f32 to vector<2x1024xf32>
    %23 = arith.addf %21, %22 : vector<2x1024xf32>
    %24 = arith.mulf %4, %4 : vector<2x1024xf32>
    %cst_8 = arith.constant 2.000000e+00 : f32
    %25 = vector.broadcast %cst_8 : f32 to vector<2x1024xf32>
    %26 = arith.mulf %25, %4 : vector<2x1024xf32>
    %27 = arith.addf %24, %26 : vector<2x1024xf32>
    %cst_9 = arith.constant 2.000000e+00 : f32
    %28 = vector.broadcast %cst_9 : f32 to vector<2x1024xf32>
    %29 = arith.addf %27, %28 : vector<2x1024xf32>
    %30 = arith.select %6, %23, %29 : vector<2x1024xi1>, vector<2x1024xf32>
    %31 = arith.divf %15, %30 : vector<2x1024xf32>
    %32 = arith.mulf %0, %31 : vector<2x1024xf32>
    %c0_10 = arith.constant 0 : index
    %c0_11 = arith.constant 0 : index
    %33 = vector.load %arg2[%c0_10, %c0_11] : memref<2x1024xf32, #tpu.memory_space<vmem>>, vector<2x1024xf32>
    tpu.vector_store %arg2[%c0_10, %c0_11], %32 {strides = array<i32>} : memref<2x1024xf32, #tpu.memory_space<vmem>>, vector<2x1024xf32>,
    return
  }
  func.func @transform_0(%arg0: i32) -> (i32, i32) {
    %c0_i32 = arith.constant 0 : i32
    %c0_i32_0 = arith.constant 0 : i32
    return %arg0, %c0_i32 : i32, i32
  }
  func.func @transform_1(%arg0: i32) -> (i32, i32) {
    %c0_i32 = arith.constant 0 : i32
    %c0_i32_0 = arith.constant 0 : i32
    return %arg0, %c0_i32 : i32, i32
  }
}

</mosaic_0001>

<bundles_post_ra>
// kernel: tpu_custom_call.1
= control target key start
LH: loop header
LB: loop body
LE: loop exit
PB: predicated region body
PF: predicated region fallthrough
CT: control target
= control target key end

     0   :  { %6 = vsyncpa [#allocation3], 0  ;;  %s170_s0 = inlined_call_operand.hbm [shape: f32[2,1024], index: 0, kind: input, shape index: {}]   ;;  %s171_s1 = inlined_call_operand.hbm [shape: f32[2,1024], index: 1, kind: output, shape index: {}]  }
   0x1   :  { %7 = vsyncpa [#allocation4], 0  ;;  %s134_s6 = smov [#allocation2]   ;;  %s86_s10 = scalar_lea.hbm %s170_s0, 256 }
   0x2   :  { %s14_s7 = sshll.u32 %s134_s6, 4  ;;  %p87_p0 = scmp.ne.s32.totalorder %s170_s0, %s86_s10  ;;  %s15_s7 = int_to_ptr.vmem [resolvable:$true] %s14_s7 }
   0x3   :  { %p90_p1 = scmp.lt.u32.totalorder %s86_s10, %s170_s0 }
   0x5   :  { %p92_p2 = pnand %p90_p1, %p87_p0 }
   0x7   :  { %95 = shalt.err (!%p92_p2)
}
   0x8   :  { %s96_s15 = scalar_lea.vmem %s15_s7, 256  ;;  %p101_p4 = scmp.lt.s32.totalorder %s15_s7, %s15_s7 }
   0x9   :  { %p97_p3 = scmp.ne.s32.totalorder %s15_s7, %s96_s15  ;;  %p102_p5 = scmp.lt.s32.totalorder %s96_s15, %s96_s15 }
   0xb   :  { %p103_p6 = por %p102_p5, %p101_p4 }
   0xd   :  { %p104_p7 = pnand %p103_p6, %p97_p3 }
   0xf   :  { %107 = shalt.err (!%p104_p7)
}
  0x10   :  { %17 = dma.hbm_to_vmem [thread:$0]  %s170_s0, 256, %s15_s7, [#allocation3]  }
  0x11   :  { %130 = dma.done.wait [#allocation3], 256  }
  0x12   :  { %131 = vsyncadd [#allocation3], 4294967040  ;;  %v21_v0 = vld [vmem:[#allocation2] sm:$0xff]  ;;  %v22_v1 = vld [vmem:[#allocation2 + $0x8] sm:$0xff]  ;;  %s135_s0 = smov [#allocation5]  }
  0x13   :  { %v23_v2 = vand.u32 2147483647, %v21_v0  ;;  %v24_v3 = vand.u32 2147483647, %v22_v1  ;;  %vm31_vm0 = vcmp.ge.f32.partialorder %v21_v0, 0.0  ;;  %vm32_vm1 = vcmp.ge.f32.partialorder %v22_v1, 0.0 }
  0x14   :  { %s67_s18 = sshll.u32 %s135_s0, 4  ;;  %s68_s18 = int_to_ptr.vmem [resolvable:$true] %s67_s18 }
  0x15   :  { %v25_v4 = vsub.f32 0.0, %v23_v2  ;;  %v26_v5 = vsub.f32 0.0, %v24_v3  ;;  %s108_s19 = scalar_lea.vmem %s68_s18, 256  ;;  %p113_p9 = scmp.lt.s32.totalorder %s68_s18, %s68_s18 }
  0x16   :  { %p109_p8 = scmp.ne.s32.totalorder %s68_s18, %s108_s19  ;;  %p114_p10 = scmp.lt.s32.totalorder %s108_s19, %s108_s19 }
  0x17   :  { %v27_v6 = vmul.f32 1.442695, %v25_v4  ;;  %v29_v7 = vmul.f32 1.442695, %v26_v5 }
  0x18   :  { %p115_p11 = por %p114_p10, %p113_p9 }
  0x19   :  { %78 = vpow2.f32 %v27_v6 }
  0x1a   :  { %80 = vpow2.f32 %v29_v7  ;;  %p116_p12 = pnand %p115_p11, %p109_p8 }
  0x23   :  { %v79_v8 = vpop.eup %78 }
  0x24   :  { %v81_v9 = vpop.eup %80  ;;  %v33_v10 = vmul.f32 2.0, %v79_v8  ;;  %v37_v11 = vmul.f32 %v79_v8, %v79_v8 }
  0x25   :  { %v34_v12 = vmul.f32 2.0, %v81_v9  ;;  %v38_v13 = vmul.f32 %v81_v9, %v81_v9 }
  0x26   :  { %v39_v14 = vadd.f32 %v37_v11, %v33_v10  ;;  %v43_v15 = vmul.f32 %v79_v8, %v33_v10  ;;  %v35_v26 = vadd.f32 1.0, %v33_v10 }
  0x27   :  { %v40_v16 = vadd.f32 %v38_v13, %v34_v12  ;;  %v44_v17 = vmul.f32 %v81_v9, %v34_v12  ;;  %v36_v27 = vadd.f32 1.0, %v34_v12 }
  0x28   :  { %v45_v18 = vadd.f32 %v43_v15, %v33_v10  ;;  %v49_v19 = vadd.f32 2.0, %v39_v14  ;;  %v41_v28 = vsel %vm31_vm0, %v35_v26, %v39_v14 }
  0x29   :  { %v46_v20 = vadd.f32 %v44_v17, %v34_v12  ;;  %v50_v21 = vadd.f32 2.0, %v40_v16  ;;  %v42_v29 = vsel %vm32_vm1, %v36_v27, %v40_v16 }
  0x2a   :  { %v47_v22 = vadd.f32 1.0, %v45_v18 }
  0x2b   :  { %v48_v23 = vadd.f32 1.0, %v46_v20 }
  0x2c   :  { %v51_v24 = vsel %vm31_vm0, %v47_v22, %v49_v19 }
  0x2d   :  { %82 = vrcp.f32 %v51_v24  ;;  %v52_v25 = vsel %vm32_vm1, %v48_v23, %v50_v21 }
  0x2e   :  { %84 = vrcp.f32 %v52_v25 }
  0x37   :  { %v83_v30 = vpop.eup %82 }
  0x38   :  { %v85_v31 = vpop.eup %84  ;;  %v54_v32 = vmul.f32 %v83_v30, %v41_v28 }
  0x39   :  { %v56_v33 = vmul.f32 %v85_v31, %v42_v29 }
  0x3a   :  { %v57_v34 = vmul.f32 %v54_v32, %v21_v0 }
  0x3b   :  { %v58_v35 = vmul.f32 %v56_v33, %v22_v1 }
  0x3c   :  { %59 = vst [vmem:[#allocation5] sm:$0xff] %v57_v34 }
  0x3d   :  { %60 = vst [vmem:[#allocation5 + $0x8] sm:$0xff] %v58_v35 }
  0x3e   :  { %119 = shalt.err (!%p116_p12)
}
  0x3f   :  { %s120_s22 = scalar_lea.hbm %s171_s1, 256 }
  0x40   :  { %p121_p13 = scmp.ne.s32.totalorder %s171_s1, %s120_s22  ;;  %p124_p0 = scmp.lt.u32.totalorder %s120_s22, %s171_s1 }
  0x42   :  { %p126_p1 = pnand %p124_p0, %p121_p13 }
  0x44   :  { %129 = shalt.err (!%p126_p1)
}
  0x45   :  { %70 = dma.vmem_to_hbm [thread:$0]  %s68_s18, 256, %s171_s1, [#allocation4]  }
  0x46   :  { %132 = dma.done.wait [#allocation4], 256  }
  0x47   :  { %133 = vsyncadd [#allocation4], 4294967040 }
  0x48   :  { %74 = vsyncpa [#allocation3], 1 }
  0x49   :  { %75 = vsyncpa [#allocation4], 1 }

</bundles_post_ra>
